<compile_context>
chip_gen: v6e
topology: v6e:2x2x1
jax: 0.10.0
libtpu: 0.0.40
codegen_flags: <defaults>
</compile_context>

<pallas_src>
import numpy as np
import jax
import jax.numpy as jnp
from jax.experimental import pallas as pl
from jax.experimental.pallas import tpu as pltpu


PRIMITIVES_ATTN = ["identity", "channel_attn", "spatial_attn"]


# --------------------------------------------------------------------------
# NAS mask construction (exact port of the PyTorch init-time logic)
# --------------------------------------------------------------------------
def _topk_indices(a, k):
    # mimic torch.topk(..., largest=True)[1] (descending indices)
    return np.argsort(-np.asarray(a), kind="stable")[:k]


def update_mask_levels(mask_levels, alpha_levels, level_idx, op_idx, levels_t):
    assert level_idx > 0
    dep_list = _topk_indices(alpha_levels[level_idx - 1, :, op_idx], levels_t)
    for dep_idx in dep_list:
        mask_levels[level_idx - 1][dep_idx][op_idx] = 1
        if level_idx - 1 > 0:
            mask_levels = update_mask_levels(
                mask_levels, alpha_levels, level_idx - 1, dep_idx, levels_t)
    return mask_levels


def build_masks(alpha_sink, alpha_levels, sink_k, levels_t, num_ops, num_levels=2):
    mask_sink = np.zeros((num_levels, num_ops), dtype=np.int32)
    mask_levels = np.zeros((num_levels - 1, num_ops, num_ops), dtype=np.int32)
    sink_selected = _topk_indices(alpha_sink, sink_k)
    for s in sink_selected:
        level_idx = int(s / num_ops)
        op_idx = int(s % num_ops)
        mask_sink[level_idx][op_idx] = 1
        if level_idx > 0:
            mask_levels = update_mask_levels(
                mask_levels, alpha_levels, level_idx, op_idx, levels_t)
    mask_source_levels_contrib = np.clip(np.sum(mask_levels[0], -1), 0, 1)
    mask_source_sink_contrib = mask_sink[0]
    mask_source = np.clip(mask_source_levels_contrib + mask_source_sink_contrib, 0, 1)
    return mask_sink, mask_levels, mask_source


# --------------------------------------------------------------------------
# Fused Pallas kernel builder
# --------------------------------------------------------------------------
def _pick_block_n(n, c, hw, dtype_bytes, target_bytes=512 * 1024):
    """Largest divisor of n whose (block_n, C, HW) x-block is near
    `target_bytes`, while (when possible) keeping the grid length >= 2 so the
    two v7x TensorCores both get work (neutral on v5e/v6e).  The fused kernel
    holds roughly ten block-sized live values (pipeline buffers + primitive
    temporaries), so ~512 KiB blocks stay well inside the scoped VMEM budgets
    of v5e/v6e/v7x while amortizing the ~0.35 us per-grid-step overhead."""
    per_sample = max(1, c * hw * dtype_bytes)
    cap = max(1, target_bytes // per_sample)
    if n >= 2:
        cap = min(cap, max(1, n // 2))     # keep >= 2 grid steps for megacore
    cap = min(cap, n)
    for d in range(cap, 0, -1):
        if n % d == 0:
            return d
    return 1


def _fused_cell_forward(ops, x_bchw, add_residual):
    """Run a chain of MixedOpAttn architectures (and optionally the residual
    `+ x`) as ONE pallas_call: a single HBM read and a single HBM write of the
    activation per forward."""
    B, C, H, W = x_bchw.shape
    N, HW = B, H * W                       # iv_mode='image': T == 1 -> N = B
    x_ncs = x_bchw.reshape(N, C, HW)

    block_n = _pick_block_n(N, C, HW, jnp.dtype(x_ncs.dtype).itemsize)
    grid = (N // block_n,)

    xy_spec = pl.BlockSpec((block_n, C, HW), lambda n: (n, 0, 0))
    in_specs = [xy_spec]
    args = [x_ncs]
    for op in ops:
        in_specs.extend(op.param_specs())
        args.extend(op.param_arrays())

    def kernel(*refs):
        x_ref = refs[0]
        pos = 1
        op_prefs = []
        for op in ops:
            k = op.num_param_refs()
            op_prefs.append(refs[pos:pos + k])
            pos += k
        o_ref = refs[pos]

        x = x_ref[...]                     # (Nb, C, HW) f32, loaded once
        y = x
        for op, prefs in zip(ops, op_prefs):
            y = op.emit(y, prefs)          # whole MixedOp traced in-VMEM
        if add_residual:
            y = y + x                      # residual fused into the store
        o_ref[...] = y.astype(o_ref.dtype)

    out = pl.pallas_call(
        kernel,
        out_shape=jax.ShapeDtypeStruct((N, C, HW), x_ncs.dtype),
        grid=grid,
        in_specs=in_specs,
        out_specs=xy_spec,
        compiler_params=pltpu.CompilerParams(
            dimension_semantics=("parallel",),
            vmem_limit_bytes=32 * 1024 * 1024),
    )(*args)
    return out.reshape(B, C, H, W)


# --------------------------------------------------------------------------
# Modules (init-time NAS selection is plain Python; compute is emitted into
# the fused Pallas kernel above)
# --------------------------------------------------------------------------
class MixedOpAttn:
    def __init__(self, alpha_sink, alpha_levels, sink_k, levels_t, primitives_attn,
                 iv_mode, num_frames, num_channels_in, key):
        self.primitives = list(primitives_attn)
        self.iv_mode = iv_mode
        self.num_ops = len(self.primitives)
        self.num_levels = 2
        assert iv_mode == "image"  # TODO(synk): video (B,T,C,H,W) path not ported
        assert int(self.num_levels * self.num_ops) == alpha_sink.shape[-1]
        assert int((self.num_levels - 1) * self.num_ops ** 2) == (
            alpha_levels.shape[0] * alpha_levels.shape[1] * alpha_levels.shape[2])
        self.mask_sink, self.mask_levels, self.mask_source = build_masks(
            alpha_sink, alpha_levels, sink_k, levels_t, self.num_ops, self.num_levels)

        # static architecture: which primitives are actually instantiated
        self.l1_ops = [i for i in range(self.num_ops) if self.mask_source[i] == 1]
        self.l2_ops = [i for i in range(self.num_ops) if self.mask_sink[1][i] == 1]
        for i in self.l2_ops:   # each level-2 op must have >= 1 level-1 contributor
            assert any(self.mask_levels[0][j][i] == 1 for j in range(self.num_ops)), (
                "level-2 op %d selected without a level-1 contributor" % i)
        self.used_ops = sorted(set(self.l1_ops) | set(self.l2_ops))

        # deterministic per-instance parameters (lane-dense biases: (1, Cr)/(1, C))
        C = num_channels_in
        Cr = max(C // 2, 1)
        self.op_params = []
        for name in self.primitives:
            key, k1, k2, k3 = jax.random.split(key, 4)
            if name == "channel_attn":
                w1 = 0.1 * jax.random.normal(k1, (Cr, C), jnp.float32)
                b1 = 0.01 * jax.random.normal(k3, (1, Cr), jnp.float32)
                w2 = 0.1 * jax.random.normal(k2, (C, Cr), jnp.float32)
                b2 = 0.01 * jax.random.normal(k1, (1, C), jnp.float32)
                self.op_params.append((w1, b1, w2, b2))
            elif name == "spatial_attn":
                self.op_params.append((0.1 * jax.random.normal(k3, (3,), jnp.float32),))
            else:  # identity
                self.op_params.append(())

        self._jit_forward = jax.jit(self._forward)

    # ---- kernel-argument plumbing -------------------------------------
    def _n_param_refs(self, i):
        name = self.primitives[i]
        return 4 if name == "channel_attn" else (1 if name == "spatial_attn" else 0)

    def num_param_refs(self):
        return sum(self._n_param_refs(i) for i in self.used_ops)

    def param_arrays(self):
        arrs = []
        for i in self.used_ops:
            arrs.extend(self.op_params[i])
        return arrs

    def param_specs(self):
        specs = []
        for i in self.used_ops:
            name = self.primitives[i]
            if name == "channel_attn":
                for p in self.op_params[i]:
                    # tiny, batch-invariant weight tiles (full-array blocks)
                    specs.append(pl.BlockSpec(p.shape, lambda n: (0, 0)))
            elif name == "spatial_attn":
                specs.append(pl.BlockSpec(memory_space=pltpu.MemorySpace.SMEM))
        return specs

    # ---- in-kernel trace of the MixedOp_attn forward -------------------
    def emit(self, y, prefs_flat):
        """Trace the MixedOp_attn forward on a VMEM-resident (Nb, C, HW) block.
        Masks are static Python, so only the selected branches are emitted."""
        prefs = {}
        pos = 0
        for i in self.used_ops:
            k = self._n_param_refs(i)
            prefs[i] = prefs_flat[pos:pos + k]
            pos += k

        def apply_prim(i, z):
            name = self.primitives[i]
            if name == "identity":
                return z
            if name == "channel_attn":
                w1r, b1r, w2r, b2r = prefs[i]
                w1, b1 = w1r[...], b1r[...]          # (Cr, C), (1, Cr)
                w2, b2 = w2r[...], b2r[...]          # (C, Cr), (1, C)
                pooled = jnp.mean(z, axis=2)         # (Nb, C) global avg pool, lane-dense
                # Tiny SE bottleneck stays on the VPU (broadcast-mul + reduce),
                # batched over the block; a (Cr,C)@(C,1) matmul would leave the
                # 128/256-wide MXU >99% idle.
                h = jnp.sum(pooled[:, None, :] * w1[None, :, :], axis=-1) + b1
                h = jnp.maximum(h, 0.0)              # (Nb, Cr)
                g = jnp.sum(h[:, None, :] * w2[None, :, :], axis=-1) + b2
                g = jax.nn.sigmoid(g)                # (Nb, C)
                return z * g[:, :, None]             # gate broadcast over HW
            if name == "spatial_attn":
                (pr,) = prefs[i]                     # (3,) scalars in SMEM
                mean_c = jnp.mean(z, axis=1, keepdims=True)   # (Nb, 1, HW)
                max_c = jnp.max(z, axis=1, keepdims=True)     # (Nb, 1, HW)
                gate = jax.nn.sigmoid(pr[0] * mean_c + pr[1] * max_c + pr[2])
                return z * gate                      # gate broadcast over C
            raise ValueError(name)

        l1 = {i: apply_prim(i, y) for i in self.l1_ops}

        sink = None
        for i in range(self.num_ops):
            if self.mask_sink[0][i] == 1:
                sink = l1[i] if sink is None else sink + l1[i]

        l2 = {}
        for i in range(self.num_ops):
            for j in range(self.num_ops):
                if self.mask_levels[0][i][j] == 1:
                    l2[j] = l1[i] if j not in l2 else l2[j] + l1[i]

        for i in range(self.num_ops):
            if self.mask_sink[1][i] == 1:
                z = apply_prim(i, l2[i])
                sink = z if sink is None else sink + z

        if sink is None:                             # cannot happen with sink_k >= 1
            sink = jnp.zeros_like(y)
        return sink

    # ---- standalone forward (one fused pallas_call, no residual) -------
    def _forward(self, x_bchw):
        return _fused_cell_forward([self], x_bchw, add_residual=False)

    def __call__(self, x_bchw):
        return self._jit_forward(x_bchw)


class CellAttn:
    """Chain of MixedOpAttn + residual, fused into ONE pallas_call."""

    def __init__(self, alpha_sink, alpha_levels, sink_k, levels_t, primitives_attn,
                 iv_mode, num_frames, num_channels_in, key):
        assert alpha_sink.shape[0] == alpha_levels.shape[0]
        op_per_cell = alpha_sink.shape[0]
        self.ops = []
        for i in range(op_per_cell):
            key, sub = jax.random.split(key)
            self.ops.append(MixedOpAttn(alpha_sink[i], alpha_levels[i], sink_k,
                                        levels_t, primitives_attn, iv_mode,
                                        num_frames, num_channels_in, sub))
        self._jit_forward = jax.jit(self._forward)

    def _forward(self, x):
        # whole cell (all MixedOps + residual) in a single kernel:
        # x is read from HBM once and the result written once.
        return _fused_cell_forward(self.ops, x, add_residual=True)

    def __call__(self, x):
        return self._jit_forward(x)


# --------------------------------------------------------------------------
# Pure-JAX reference (same synthesized primitives) for a correctness check
# --------------------------------------------------------------------------
def _reference_mixedop(op, y):
    def apply_ref(i, z):
        name = op.primitives[i]
        if name == "identity":
            return z
        if name == "channel_attn":
            w1, b1, w2, b2 = op.op_params[i]
            pooled = jnp.mean(z, axis=2)
            h = jnp.maximum(pooled @ w1.T + b1, 0.0)
            g = jax.nn.sigmoid(h @ w2.T + b2)
            return z * g[:, :, None]
        if name == "spatial_attn":
            (p,) = op.op_params[i]
            mean_c = jnp.mean(z, axis=1, keepdims=True)
            max_c = jnp.max(z, axis=1, keepdims=True)
            gate = jax.nn.sigmoid(p[0] * mean_c + p[1] * max_c + p[2])
            return z * gate
        raise ValueError(name)

    n = op.num_ops
    l1 = [0] * n
    sink = 0
    for i in range(n):
        if op.mask_source[i] == 1:
            l1[i] = apply_ref(i, y)
        if op.mask_sink[0][i] == 1:
            sink = sink + l1[i]
    l2 = [0] * n
    for i in range(n):
        for j in range(n):
            if op.mask_levels[0][i][j] == 1:
                l2[j] = l2[j] + l1[i]
    for i in range(n):
        if op.mask_sink[1][i] == 1:
            sink = sink + apply_ref(i, l2[i])
    return sink


def _reference_cell(cell, x):
    B, C, H, W = x.shape
    y0 = x.reshape(B, C, H * W)
    out = y0
    for op in cell.ops:
        out = _reference_mixedop(op, out)
    return (out + y0).reshape(B, C, H, W)


# --------------------------------------------------------------------------
if __name__ == "__main__":
    B, C, H, W = 2, 8, 16, 16          # HW = 256 (lane-aligned), C = 8 (sublane-aligned)
    num_ops = len(PRIMITIVES_ATTN)     # 3
    op_per_cell = 2
    sink_k, levels_t = 2, 1
    iv_mode, num_frames = "image", 1

    # deterministic NAS alphas (init-time architecture selection)
    rng = np.random.RandomState(0)
    alpha_sink = rng.randn(op_per_cell, 2 * num_ops).astype(np.float32)
    alpha_levels = rng.randn(op_per_cell, 1, num_ops, num_ops).astype(np.float32)

    key = jax.random.PRNGKey(0)
    kx, kp = jax.random.split(key)
    x = jax.random.normal(kx, (B, C, H, W), jnp.float32)

    cell = CellAttn(alpha_sink, alpha_levels, sink_k, levels_t, PRIMITIVES_ATTN,
                    iv_mode, num_frames, C, kp)

    out = jax.block_until_ready(cell(x))
    ref = jax.block_until_ready(_reference_cell(cell, x))

    assert out.shape == (B, C, H, W) and out.dtype == jnp.float32
    assert bool(jnp.all(jnp.isfinite(out)))
    np.testing.assert_allclose(np.asarray(out), np.asarray(ref), rtol=2e-3, atol=2e-3)
    print("KERNEL_OK")
</pallas_src>

<mosaic_0001>
module attributes {stable_mosaic.version = 11 : i64} {
  func.func @kernel(%arg0: i32, %arg1: memref<1x8x256xf32, #tpu.memory_space<vmem>>, %arg2: memref<4x8xf32, #tpu.memory_space<vmem>>, %arg3: memref<1x4xf32, #tpu.memory_space<vmem>>, %arg4: memref<8x4xf32, #tpu.memory_space<vmem>>, %arg5: memref<1x8xf32, #tpu.memory_space<vmem>>, %arg6: memref<3xf32, #tpu.memory_space<smem>>, %arg7: memref<1x8x256xf32, #tpu.memory_space<vmem>>) attributes {dimension_semantics = [#tpu.dimension_semantics<parallel>], iteration_bounds = array<i64: 2>, scalar_prefetch = 0 : i64, scratch_operands = 0 : i64, tpu.core_type = #tpu.core_type<tc>, window_params = [{transform_indices = @transform_0, window_bounds = array<i64: 1, 8, 256>}, {pipeline_mode = #tpu.pipeline_mode<synchronous>, transform_indices = @transform_1, window_bounds = array<i64: 4, 8>}, {pipeline_mode = #tpu.pipeline_mode<synchronous>, transform_indices = @transform_2, window_bounds = array<i64: 1, 4>}, {pipeline_mode = #tpu.pipeline_mode<synchronous>, transform_indices = @transform_3, window_bounds = array<i64: 8, 4>}, {pipeline_mode = #tpu.pipeline_mode<synchronous>, transform_indices = @transform_4, window_bounds = array<i64: 1, 8>}, {transform_indices = @transform_5, window_bounds = array<i64: 3>}, {transform_indices = @transform_6, window_bounds = array<i64: 1, 8, 256>}]} {
    %c0 = arith.constant 0 : index
    %c0_0 = arith.constant 0 : index
    %c0_1 = arith.constant 0 : index
    %0 = vector.load %arg1[%c0, %c0_0, %c0_1] : memref<1x8x256xf32, #tpu.memory_space<vmem>>, vector<1x8x256xf32>
    %c0_2 = arith.constant 0 : index
    %c0_3 = arith.constant 0 : index
    %1 = vector.load %arg2[%c0_2, %c0_3] : memref<4x8xf32, #tpu.memory_space<vmem>>, vector<4x8xf32>
    %c0_4 = arith.constant 0 : index
    %c0_5 = arith.constant 0 : index
    %2 = vector.load %arg3[%c0_4, %c0_5] : memref<1x4xf32, #tpu.memory_space<vmem>>, vector<1x4xf32>
    %c0_6 = arith.constant 0 : index
    %c0_7 = arith.constant 0 : index
    %3 = vector.load %arg4[%c0_6, %c0_7] : memref<8x4xf32, #tpu.memory_space<vmem>>, vector<8x4xf32>
    %c0_8 = arith.constant 0 : index
    %c0_9 = arith.constant 0 : index
    %4 = vector.load %arg5[%c0_8, %c0_9] : memref<1x8xf32, #tpu.memory_space<vmem>>, vector<1x8xf32>
    %cst = arith.constant dense<0.000000e+00> : vector<1x8xf32>
    %5 = vector.multi_reduction <add>, %0, %cst [2] : vector<1x8x256xf32> to vector<1x8xf32>
    %cst_10 = arith.constant 2.560000e+02 : f32
    %6 = vector.broadcast %cst_10 : f32 to vector<1x8xf32>
    %7 = arith.divf %5, %6 : vector<1x8xf32>
    %8 = vector.shape_cast %7 : vector<1x8xf32> to vector<1x1x8xf32>
    %9 = vector.shape_cast %1 : vector<4x8xf32> to vector<1x4x8xf32>
    %10 = vector.broadcast %8 : vector<1x1x8xf32> to vector<1x4x8xf32>
    %11 = arith.mulf %10, %9 : vector<1x4x8xf32>
    %cst_11 = arith.constant dense<0.000000e+00> : vector<1x4xf32>
    %12 = vector.multi_reduction <add>, %11, %cst_11 [2] : vector<1x4x8xf32> to vector<1x4xf32>
    %13 = arith.addf %12, %2 : vector<1x4xf32>
    %cst_12 = arith.constant 0.000000e+00 : f32
    %14 = vector.broadcast %cst_12 : f32 to vector<1x4xf32>
    %15 = arith.maximumf %13, %14 : vector<1x4xf32>
    %16 = vector.shape_cast %15 : vector<1x4xf32> to vector<1x1x4xf32>
    %17 = vector.shape_cast %3 : vector<8x4xf32> to vector<1x8x4xf32>
    %18 = vector.broadcast %16 : vector<1x1x4xf32> to vector<1x8x4xf32>
    %19 = arith.mulf %18, %17 : vector<1x8x4xf32>
    %cst_13 = arith.constant dense<0.000000e+00> : vector<1x8xf32>
    %20 = vector.multi_reduction <add>, %19, %cst_13 [2] : vector<1x8x4xf32> to vector<1x8xf32>
    %21 = arith.addf %20, %4 : vector<1x8xf32>
    %22 = arith.negf %21 : vector<1x8xf32>
    %23 = math.exp %22 : vector<1x8xf32>
    %cst_14 = arith.constant 1.000000e+00 : f32
    %24 = vector.broadcast %cst_14 : f32 to vector<1x8xf32>
    %25 = arith.addf %24, %23 : vector<1x8xf32>
    %26 = arith.divf %24, %25 : vector<1x8xf32>
    %27 = vector.shape_cast %26 : vector<1x8xf32> to vector<1x8x1xf32>
    %28 = vector.broadcast %27 : vector<1x8x1xf32> to vector<1x8x256xf32>
    %29 = arith.mulf %0, %28 : vector<1x8x256xf32>
    %c0_15 = arith.constant 0 : index
    %c0_16 = arith.constant 0 : index
    %30 = vector.load %arg2[%c0_15, %c0_16] : memref<4x8xf32, #tpu.memory_space<vmem>>, vector<4x8xf32>
    %c0_17 = arith.constant 0 : index
    %c0_18 = arith.constant 0 : index
    %31 = vector.load %arg3[%c0_17, %c0_18] : memref<1x4xf32, #tpu.memory_space<vmem>>, vector<1x4xf32>
    %c0_19 = arith.constant 0 : index
    %c0_20 = arith.constant 0 : index
    %32 = vector.load %arg4[%c0_19, %c0_20] : memref<8x4xf32, #tpu.memory_space<vmem>>, vector<8x4xf32>
    %c0_21 = arith.constant 0 : index
    %c0_22 = arith.constant 0 : index
    %33 = vector.load %arg5[%c0_21, %c0_22] : memref<1x8xf32, #tpu.memory_space<vmem>>, vector<1x8xf32>
    %cst_23 = arith.constant dense<0.000000e+00> : vector<1x8xf32>
    %34 = vector.multi_reduction <add>, %29, %cst_23 [2] : vector<1x8x256xf32> to vector<1x8xf32>
    %cst_24 = arith.constant 2.560000e+02 : f32
    %35 = vector.broadcast %cst_24 : f32 to vector<1x8xf32>
    %36 = arith.divf %34, %35 : vector<1x8xf32>
    %37 = vector.shape_cast %36 : vector<1x8xf32> to vector<1x1x8xf32>
    %38 = vector.shape_cast %30 : vector<4x8xf32> to vector<1x4x8xf32>
    %39 = vector.broadcast %37 : vector<1x1x8xf32> to vector<1x4x8xf32>
    %40 = arith.mulf %39, %38 : vector<1x4x8xf32>
    %cst_25 = arith.constant dense<0.000000e+00> : vector<1x4xf32>
    %41 = vector.multi_reduction <add>, %40, %cst_25 [2] : vector<1x4x8xf32> to vector<1x4xf32>
    %42 = arith.addf %41, %31 : vector<1x4xf32>
    %cst_26 = arith.constant 0.000000e+00 : f32
    %43 = vector.broadcast %cst_26 : f32 to vector<1x4xf32>
    %44 = arith.maximumf %42, %43 : vector<1x4xf32>
    %45 = vector.shape_cast %44 : vector<1x4xf32> to vector<1x1x4xf32>
    %46 = vector.shape_cast %32 : vector<8x4xf32> to vector<1x8x4xf32>
    %47 = vector.broadcast %45 : vector<1x1x4xf32> to vector<1x8x4xf32>
    %48 = arith.mulf %47, %46 : vector<1x8x4xf32>
    %cst_27 = arith.constant dense<0.000000e+00> : vector<1x8xf32>
    %49 = vector.multi_reduction <add>, %48, %cst_27 [2] : vector<1x8x4xf32> to vector<1x8xf32>
    %50 = arith.addf %49, %33 : vector<1x8xf32>
    %51 = arith.negf %50 : vector<1x8xf32>
    %52 = math.exp %51 : vector<1x8xf32>
    %cst_28 = arith.constant 1.000000e+00 : f32
    %53 = vector.broadcast %cst_28 : f32 to vector<1x8xf32>
    %54 = arith.addf %53, %52 : vector<1x8xf32>
    %55 = arith.divf %53, %54 : vector<1x8xf32>
    %56 = vector.shape_cast %55 : vector<1x8xf32> to vector<1x8x1xf32>
    %57 = vector.broadcast %56 : vector<1x8x1xf32> to vector<1x8x256xf32>
    %58 = arith.mulf %29, %57 : vector<1x8x256xf32>
    %59 = arith.addf %0, %58 : vector<1x8x256xf32>
    %cst_29 = arith.constant dense<0.000000e+00> : vector<1x256xf32>
    %60 = vector.multi_reduction <add>, %59, %cst_29 [1] : vector<1x8x256xf32> to vector<1x256xf32>
    %61 = vector.shape_cast %60 : vector<1x256xf32> to vector<1x1x256xf32>
    %cst_30 = arith.constant 8.000000e+00 : f32
    %62 = vector.broadcast %cst_30 : f32 to vector<1x1x256xf32>
    %63 = arith.divf %61, %62 : vector<1x1x256xf32>
    %cst_31 = arith.constant dense<0xFF800000> : vector<1x256xf32>
    %64 = vector.multi_reduction <maximumf>, %59, %cst_31 [1] : vector<1x8x256xf32> to vector<1x256xf32>
    %65 = vector.shape_cast %64 : vector<1x256xf32> to vector<1x1x256xf32>
    %c0_32 = arith.constant 0 : index
    %66 = memref.load %arg6[%c0_32] : memref<3xf32, #tpu.memory_space<smem>>
    %67 = vector.broadcast %66 : f32 to vector<1x1x256xf32>
    %68 = arith.mulf %67, %63 : vector<1x1x256xf32>
    %c1 = arith.constant 1 : index
    %69 = memref.load %arg6[%c1] : memref<3xf32, #tpu.memory_space<smem>>
    %70 = vector.broadcast %69 : f32 to vector<1x1x256xf32>
    %71 = arith.mulf %70, %65 : vector<1x1x256xf32>
    %72 = arith.addf %68, %71 : vector<1x1x256xf32>
    %c2 = arith.constant 2 : index
    %73 = memref.load %arg6[%c2] : memref<3xf32, #tpu.memory_space<smem>>
    %74 = vector.broadcast %73 : f32 to vector<1x1x256xf32>
    %75 = arith.addf %72, %74 : vector<1x1x256xf32>
    %76 = arith.negf %75 : vector<1x1x256xf32>
    %77 = math.exp %76 : vector<1x1x256xf32>
    %cst_33 = arith.constant 1.000000e+00 : f32
    %78 = vector.broadcast %cst_33 : f32 to vector<1x1x256xf32>
    %79 = arith.addf %78, %77 : vector<1x1x256xf32>
    %80 = arith.divf %78, %79 : vector<1x1x256xf32>
    %81 = vector.broadcast %80 : vector<1x1x256xf32> to vector<1x8x256xf32>
    %82 = arith.mulf %59, %81 : vector<1x8x256xf32>
    %cst_34 = arith.constant dense<0.000000e+00> : vector<1x256xf32>
    %83 = vector.multi_reduction <add>, %82, %cst_34 [1] : vector<1x8x256xf32> to vector<1x256xf32>
    %84 = vector.shape_cast %83 : vector<1x256xf32> to vector<1x1x256xf32>
    %cst_35 = arith.constant 8.000000e+00 : f32
    %85 = vector.broadcast %cst_35 : f32 to vector<1x1x256xf32>
    %86 = arith.divf %84, %85 : vector<1x1x256xf32>
    %cst_36 = arith.constant dense<0xFF800000> : vector<1x256xf32>
    %87 = vector.multi_reduction <maximumf>, %82, %cst_36 [1] : vector<1x8x256xf32> to vector<1x256xf32>
    %88 = vector.shape_cast %87 : vector<1x256xf32> to vector<1x1x256xf32>
    %c0_37 = arith.constant 0 : index
    %89 = memref.load %arg6[%c0_37] : memref<3xf32, #tpu.memory_space<smem>>
    %90 = vector.broadcast %89 : f32 to vector<1x1x256xf32>
    %91 = arith.mulf %90, %86 : vector<1x1x256xf32>
    %c1_38 = arith.constant 1 : index
    %92 = memref.load %arg6[%c1_38] : memref<3xf32, #tpu.memory_space<smem>>
    %93 = vector.broadcast %92 : f32 to vector<1x1x256xf32>
    %94 = arith.mulf %93, %88 : vector<1x1x256xf32>
    %95 = arith.addf %91, %94 : vector<1x1x256xf32>
    %c2_39 = arith.constant 2 : index
    %96 = memref.load %arg6[%c2_39] : memref<3xf32, #tpu.memory_space<smem>>
    %97 = vector.broadcast %96 : f32 to vector<1x1x256xf32>
    %98 = arith.addf %95, %97 : vector<1x1x256xf32>
    %99 = arith.negf %98 : vector<1x1x256xf32>
    %100 = math.exp %99 : vector<1x1x256xf32>
    %cst_40 = arith.constant 1.000000e+00 : f32
    %101 = vector.broadcast %cst_40 : f32 to vector<1x1x256xf32>
    %102 = arith.addf %101, %100 : vector<1x1x256xf32>
    %103 = arith.divf %101, %102 : vector<1x1x256xf32>
    %104 = vector.broadcast %103 : vector<1x1x256xf32> to vector<1x8x256xf32>
    %105 = arith.mulf %82, %104 : vector<1x8x256xf32>
    %106 = arith.addf %59, %105 : vector<1x8x256xf32>
    %107 = arith.addf %106, %0 : vector<1x8x256xf32>
    %c0_41 = arith.constant 0 : index
    %c0_42 = arith.constant 0 : index
    %c0_43 = arith.constant 0 : index
    %108 = vector.load %arg7[%c0_41, %c0_42, %c0_43] : memref<1x8x256xf32, #tpu.memory_space<vmem>>, vector<1x8x256xf32>
    tpu.vector_store %arg7[%c0_41, %c0_42, %c0_43], %107 {strides = array<i32>} : memref<1x8x256xf32, #tpu.memory_space<vmem>>, vector<1x8x256xf32>,
    return
  }
  func.func @transform_0(%arg0: i32) -> (i32, i32, i32) {
    %c0_i32 = arith.constant 0 : i32
    %c0_i32_0 = arith.constant 0 : i32
    %c0_i32_1 = arith.constant 0 : i32
    return %arg0, %c0_i32, %c0_i32_0 : i32, i32, i32
  }
  func.func @transform_1(%arg0: i32) -> (i32, i32) {
    %c0_i32 = arith.constant 0 : i32
    %c0_i32_0 = arith.constant 0 : i32
    %c0_i32_1 = arith.constant 0 : i32
    return %c0_i32, %c0_i32_0 : i32, i32
  }
  func.func @transform_2(%arg0: i32) -> (i32, i32) {
    %c0_i32 = arith.constant 0 : i32
    %c0_i32_0 = arith.constant 0 : i32
    %c0_i32_1 = arith.constant 0 : i32
    return %c0_i32, %c0_i32_0 : i32, i32
  }
  func.func @transform_3(%arg0: i32) -> (i32, i32) {
    %c0_i32 = arith.constant 0 : i32
    %c0_i32_0 = arith.constant 0 : i32
    %c0_i32_1 = arith.constant 0 : i32
    return %c0_i32, %c0_i32_0 : i32, i32
  }
  func.func @transform_4(%arg0: i32) -> (i32, i32) {
    %c0_i32 = arith.constant 0 : i32
    %c0_i32_0 = arith.constant 0 : i32
    %c0_i32_1 = arith.constant 0 : i32
    return %c0_i32, %c0_i32_0 : i32, i32
  }
  func.func @transform_5(%arg0: i32) -> i32 {
    %c0_i32 = arith.constant 0 : i32
    %c0_i32_0 = arith.constant 0 : i32
    return %c0_i32 : i32
  }
  func.func @transform_6(%arg0: i32) -> (i32, i32, i32) {
    %c0_i32 = arith.constant 0 : i32
    %c0_i32_0 = arith.constant 0 : i32
    %c0_i32_1 = arith.constant 0 : i32
    return %arg0, %c0_i32, %c0_i32_0 : i32, i32, i32
  }
}

</mosaic_0001>

<bundles_post_ra>
// kernel: _forward.1
= control target key start
LH: loop header
LB: loop body
LE: loop exit
PB: predicated region body
PF: predicated region fallthrough
CT: control target
= control target key end

     0   :  { %11 = vsyncpa [#allocation3], 0  ;;  %s1005_s21 = smov 0   ;;  %s1206_s0 = inlined_call_operand.vmem [shape: f32[2,8,256], index: 0, kind: input, shape index: {}]   ;;  %s1207_s1 = inlined_call_operand.vmem [shape: f32[4,8], index: 1, kind: input, shape index: {}]   ;;  %s1208_s2 = inlined_call_operand.vmem [shape: f32[1,4], index: 2, kind: input, shape index: {}]   ;;  %s1209_s3 = inlined_call_operand.vmem [shape: f32[8,4], index: 3, kind: input, shape index: {}]   ;;  %s1210_s4 = inlined_call_operand.vmem [shape: f32[1,8], index: 4, kind: input, shape index: {}]   ;;  %s1211_s5 = inlined_call_operand.vmem [shape: f32[3], index: 5, kind: input, shape index: {}]   ;;  %s1212_s6 = inlined_call_operand.vmem [shape: f32[2,8,256], index: 6, kind: output, shape index: {}]  }
   0x1 LB: > { %s870_s22 = sadd.s32 4294967295, %s966_s21   ;;  %p872_p0 = scmp.ge.s32.totalorder %s966_s21, 1  ;;  %s966_s21 = sphi %s1005_s21, %s17_s21  }
   0x2   : > { %p179_p1 = scmp.lt.s32.totalorder %s966_s21, 3  ;;  %s204_s25 = sshll.u32 %s1211_s5, 4  ;;  %s205_s25 = int_to_ptr.vmem [resolvable:$true] %s204_s25 }
   0x3   : > { %p903_p3 = scmp.eq.s32.totalorder %s870_s22, 0  ;;  %s941_s27 = scalar_lea.vmem %s205_s25, 16 }
   0x4   : > { %p1016_p2 = pnand %p872_p0, %p179_p1  ;;  %p942_p6 = scmp.ne.s32.totalorder %s205_s25, %s941_s27 }
   0x5   : > { %p949_p10 = scmp.lt.s32.totalorder %s205_s25, %s205_s25  ;;  %p950_p11 = scmp.lt.s32.totalorder %s941_s27, %s941_s27 }
   0x6   : > { %p899_p4 = pneg %p1016_p2 }
   0x7   : > { %p951_p12 = por %p950_p11, %p949_p10 }
   0x8   : > { %p900_p5 = pnand %p903_p3, %p899_p4 }
   0xa   : > { %p943_p7 = pneg %p900_p5 }
   0xc   : > { %p944_p8 = pnand %p943_p7, %p942_p6 }
   0xe   : > { %p945_p9 = pneg %p944_p8 }
  0x10   : > { %p952_p13 = pnand %p951_p12, %p945_p9 }
  0x12   : > { %955 = shalt.err (!%p952_p13)
}
  0x13   : > { %s968_s28 = smov [#allocation2]   ;;  %225 = sbr.rel (%p1016_p2) target bundleno = 1907 (0x773), region = 44 }
  0x14   : > { %902 = dma.vmem_to_smem (!%p900_p5), %s205_s25, 16, %s968_s28, [#allocation3]  }
  0x18   : > { %961 = dma.done.wait (%p903_p3), [#allocation3], 16  }
  0x19   : > { %963 = vsyncadd (%p903_p3), [#allocation3], 4294967280 }
  0x1a   : > { %231 = sfence }
  0x1b   : > { %p256_p0 = scmp.lt.s32.totalorder %s870_s22, 1  ;;  %v278_v0 = vlaneseq  ;;  %v268_v2 = vld [vmem:[%s1207_s1] sm:$0xf]  ;;  %v969_v13 = vmov 0   ;;  %vm348_vm0 = vcmask 1041409   ;;  %vm350_vm1 = vcmask 1042434  }
  0x1c   : > { %915 = vset.pattern.permute.xlu1 %v969_v13  ;;  %916 = vset.pattern.permute.xlu0 %v969_v13  ;;  %v881_v25 = vld [vmem:[%s1208_s2] ss:$0 sm:$0xff]  ;;  %vm352_vm2 = vcmask 1043459   ;;  %vm355_vm3 = vcmask 60416   ;;  %vm510_vm4 = vcmask 1044484   ;;  %vm512_vm5 = vcmask 1045509  }
  0x1d   : > { %s1215_s22 = smov (!%p256_p0, %s870_s22), 1  ;;  %v1029_v1 = vshrl.u32 %v278_v0, 7  ;;  %v270_v26 = vld [vmem:[%s1209_s3] sm:$0xff]  ;;  %v331_v38 = vand.u32 127, %v278_v0  ;;  %vm514_vm6 = vcmask 1046534   ;;  %vm516_vm7 = vcmask 1047559  }
  0x1e   : > { %s893_s7 = sshll.u32 %s1215_s22, 4  ;;  %vm519_vm8 = vcmask 31744   ;;  %s721_s17 = sld [smem:[#allocation2]] }
  0x1f   : > { %v287_v3 = vsub.s32 1, %v1029_v1  ;;  %v294_v4 = vsub.s32 2, %v1029_v1  ;;  %s260_s10 = scalar_lea.vmem %s1206_s0, %s893_s7  ;;  %v301_v10 = vsub.s32 3, %v1029_v1  ;;  %v280_v12 = vsub.s32 0, %v1029_v1  ;;  %s885_s18 = sld [smem:[#allocation2 + $0x1]] }
  0x20   : > { %v1042_v5 = vld [vmem:[%s260_s10] sm:$0xff]  ;;  %v1044_v6 = vld [vmem:[%s260_s10 + $0x8] sm:$0xff]  ;;  %v401_v31 = vsub.s32 4, %v1029_v1  ;;  %v408_v33 = vsub.s32 5, %v1029_v1  ;;  %v415_v35 = vsub.s32 6, %v1029_v1  ;;  %v1072_v40 = vsub.s32 %v331_v38, %v1029_v1  ;;  %s886_s19 = sld [smem:[#allocation2 + $0x2]]  ;;  %s265_s24 = scalar_lea.vmem %s1212_s6, %s893_s7 }
  0x21   : > { %v288_v7 = vrot.slane %v268_v2, %v287_v3  ;;  %v272_v8 = vadd.f32 %v1044_v6, %v1042_v5  ;;  %v295_v9 = vrot.slane %v268_v2, %v294_v4  ;;  %v302_v11 = vrot.slane %v268_v2, %v301_v10 }
  0x22   : > { %v281_v14 = vrot.slane %v268_v2, %v280_v12  ;;  %v374_v27 = vrot.slane %v270_v26, %v280_v12  ;;  %v381_v28 = vrot.slane %v270_v26, %v287_v3  ;;  %v388_v29 = vrot.slane %v270_v26, %v294_v4 }
  0x23   : > { %290 = vbcast.lane.b32.xlu1 %v288_v7, 256  ;;  %273 = vadd.xlane.f32.xlu0 %v272_v8  ;;  %v395_v30 = vrot.slane %v270_v26, %v301_v10  ;;  %v402_v32 = vrot.slane %v270_v26, %v401_v31  ;;  %v409_v34 = vrot.slane %v270_v26, %v408_v33  ;;  %v422_v51 = vsub.s32 7, %v1029_v1 }
  0x24   : > { %v416_v36 = vrot.slane %v270_v26, %v415_v35 }
  0x25   : > { %v423_v52 = vrot.slane %v270_v26, %v422_v51 }
  0x27   : > { %297 = vbcast.lane.b32.xlu1 %v295_v9, 256 }
  0x2b   : > { %304 = vbcast.lane.b32.xlu1 %v302_v11, 256  ;;  %v882_v11 = vld [vmem:[%s1210_s4] ss:$0 sm:$0xff] }
  0x39   : > { %283 = vbcast.lane.b32.xlu0 %v281_v14, 256 }
  0x95   : > { %v1050_v16 = vpop.permute.xlu1 %290 }
  0x99   : > { %v1055_v20 = vpop.permute.xlu1 %297 }
  0x9d   : > { %v1059_v23 = vpop.permute.xlu1 %304 }
  0xac   : > { %v274_v15 = vpop.xlane.xlu0 %273 }
  0xad   : > { %v276_v17 = vmul.f32 0.00390625, %v274_v15 }
  0xaf   : > { %v311_v21 = vmul.f32 %v1050_v16, %v276_v17  ;;  %v312_v22 = vmul.f32 %v1055_v20, %v276_v17  ;;  %v313_v24 = vmul.f32 %v1059_v23, %v276_v17 }
  0xb0   : > { %v1052_v18 = vpop.permute.xlu0 %283 }
  0xb1   : > { %v310_v19 = vmul.f32 %v1052_v18, %v276_v17 }
  0xb3   : > { %319 = vperm.xlu1 %915, %v310_v19  }
  0xb7   : > { %322 = vperm.xlu1 %915, %v311_v21  }
  0xbb   : > { %325 = vperm.xlu1 %915, %v312_v22  }
  0xbf   : > { %328 = vperm.xlu1 %915, %v313_v24  }
  0xc3   : > { %365 = vbcast.lane.b32.xlu1 %v881_v25, 256 }
  0xc7   : > { %376 = vbcast.lane.b32.xlu1 %v374_v27, 256 }
  0xcb   : > { %383 = vbcast.lane.b32.xlu1 %v381_v28, 256 }
  0xcf   : > { %390 = vbcast.lane.b32.xlu1 %v388_v29, 256 }
  0xd3   : > { %397 = vbcast.lane.b32.xlu1 %v395_v30, 256 }
  0xd7   : > { %404 = vbcast.lane.b32.xlu1 %v402_v32, 256 }
  0xdb   : > { %411 = vbcast.lane.b32.xlu1 %v409_v34, 256 }
  0xdf   : > { %418 = vbcast.lane.b32.xlu1 %v416_v36, 256 }
 0x12e   : > { %v320_v37 = vpop.permute.xlu1 %319 }
 0x12f   : > { %v335_v44 = vrot.slane %v320_v37, %v1072_v40 }
 0x132   : > { %v323_v39 = vpop.permute.xlu1 %322 }
 0x133   : > { %v339_v42 = vrot.slane %v323_v39, %v1072_v40 }
 0x135   : > { %v349_v46 = vsel %vm348_vm0, %v339_v42, %v335_v44 }
 0x136   : > { %v326_v41 = vpop.permute.xlu1 %325 }
 0x137   : > { %v343_v43 = vrot.slane %v326_v41, %v1072_v40 }
 0x139   : > { %v351_v48 = vsel %vm350_vm1, %v343_v43, %v349_v46 }
 0x13a   : > { %v329_v45 = vpop.permute.xlu1 %328 }
 0x13b   : > { %v347_v47 = vrot.slane %v329_v45, %v1072_v40 }
 0x13d   : > { %v353_v49 = vsel %vm352_vm2, %v347_v47, %v351_v48 }
 0x13e   : > { %v356_v50 = vsel %vm355_vm3, %v353_v49, 0.0  ;;  %v1083_v53 = vpop.permute.xlu1 %365 }
 0x13f   : > { %357 = vadd.xlane.f32.xlu0 %v356_v50 }
 0x142   : > { %v1085_v54 = vpop.permute.xlu1 %376 }
 0x146   : > { %v1087_v55 = vpop.permute.xlu1 %383 }
 0x14a   : > { %v1089_v56 = vpop.permute.xlu1 %390 }
 0x14e   : > { %v1091_v57 = vpop.permute.xlu1 %397 }
 0x152   : > { %v1093_v58 = vpop.permute.xlu1 %404 }
 0x155   : > { %425 = vbcast.lane.b32.xlu0 %v423_v52, 256 }
 0x156   : > { %v1096_v62 = vpop.permute.xlu1 %411 }
 0x15a   : > { %v1104_v7 = vpop.permute.xlu1 %418 }
 0x1c8   : > { %v358_v59 = vpop.xlane.xlu0 %357 }
 0x1c9   : > { %v368_v60 = vadd.f32 %v1083_v53, %v358_v59 }
 0x1cb   : > { %v369_v61 = vmax.f32 %v368_v60, 0.0 }
 0x1cc   : > { %v1107_v9 = vpop.permute.xlu0 %425 }
 0x1cd   : > { %v440_v63 = vmul.f32 %v1096_v62, %v369_v61  ;;  %v435_v0 = vmul.f32 %v1085_v54, %v369_v61  ;;  %v436_v1 = vmul.f32 %v1087_v55, %v369_v61  ;;  %v437_v2 = vmul.f32 %v1089_v56, %v369_v61 }
 0x1ce   : > { %v438_v3 = vmul.f32 %v1091_v57, %v369_v61  ;;  %v439_v4 = vmul.f32 %v1093_v58, %v369_v61  ;;  %v441_v8 = vmul.f32 %v1104_v7, %v369_v61  ;;  %v442_v10 = vmul.f32 %v1107_v9, %v369_v61 }
 0x1cf   : > { %452 = vperm.xlu1 %915, %v435_v0   ;;  %467 = vperm.xlu0 %916, %v440_v63  }
 0x1d3   : > { %455 = vperm.xlu1 %915, %v436_v1  }
 0x1d7   : > { %458 = vperm.xlu1 %915, %v437_v2  }
 0x1db   : > { %461 = vperm.xlu1 %915, %v438_v3  }
 0x1df   : > { %464 = vperm.xlu1 %915, %v439_v4  }
 0x1e3   : > { %470 = vperm.xlu1 %915, %v441_v8  }
 0x1e7   : > { %473 = vperm.xlu1 %915, %v442_v10  }
 0x1eb   : > { %529 = vbcast.lane.b32.xlu1 %v882_v11, 256 }
 0x24a   : > { %v453_v12 = vpop.permute.xlu1 %452  ;;  %v468_v27 = vpop.permute.xlu0 %467 }
 0x24b   : > { %v478_v22 = vrot.slane %v453_v12, %v1072_v40  ;;  %v498_v33 = vrot.slane %v468_v27, %v1072_v40 }
 0x24e   : > { %v456_v13 = vpop.permute.xlu1 %455 }
 0x24f   : > { %v482_v17 = vrot.slane %v456_v13, %v1072_v40 }
 0x251   : > { %v507_v26 = vsel %vm348_vm0, %v482_v17, %v478_v22 }
 0x252   : > { %v459_v14 = vpop.permute.xlu1 %458 }
 0x253   : > { %v486_v19 = vrot.slane %v459_v14, %v1072_v40 }
 0x255   : > { %v508_v28 = vsel %vm350_vm1, %v486_v19, %v507_v26 }
 0x256   : > { %v462_v15 = vpop.permute.xlu1 %461 }
 0x257   : > { %v490_v24 = vrot.slane %v462_v15, %v1072_v40 }
 0x259   : > { %v509_v30 = vsel %vm352_vm2, %v490_v24, %v508_v28 }
 0x25a   : > { %v465_v21 = vpop.permute.xlu1 %464 }
 0x25b   : > { %v494_v25 = vrot.slane %v465_v21, %v1072_v40 }
 0x25d   : > { %v511_v31 = vsel %vm510_vm4, %v494_v25, %v509_v30 }
 0x25e   : > { %v471_v29 = vpop.permute.xlu1 %470  ;;  %v513_v36 = vsel %vm512_vm5, %v498_v33, %v511_v31 }
 0x25f   : > { %v502_v32 = vrot.slane %v471_v29, %v1072_v40 }
 0x261   : > { %v515_v37 = vsel %vm514_vm6, %v502_v32, %v513_v36 }
 0x262   : > { %v474_v34 = vpop.permute.xlu1 %473 }
 0x263   : > { %v506_v35 = vrot.slane %v474_v34, %v1072_v40 }
 0x265   : > { %v517_v38 = vsel %vm516_vm7, %v506_v35, %v515_v37 }
 0x266   : > { %v520_v39 = vsel %vm519_vm8, %v517_v38, 0.0  ;;  %v1129_v41 = vpop.permute.xlu1 %529 }
 0x267   : > { %521 = vadd.xlane.f32.xlu0 %v520_v39 }
 0x2f0   : > { %v522_v42 = vpop.xlane.xlu0 %521 }
 0x2f1   : > { %v532_v43 = vadd.f32 %v1129_v41, %v522_v42 }
 0x2f3   : > { %v883_v44 = vmul.f32 -1.442695, %v532_v43 }
 0x2f5   : > { %917 = vpow2.f32 %v883_v44 }
 0x302   : > { %v918_v45 = vpop.eup %917 }
 0x303   : > { %v536_v46 = vadd.f32 1.0, %v918_v45 }
 0x305   : > { %919 = vrcp.f32 %v536_v46 }
 0x312   : > { %v920_v47 = vpop.eup %919 }
 0x313   : > { %541 = vperm.xlu1 %915, %v920_v47  }
 0x38e   : > { %v542_v48 = vpop.permute.xlu1 %541 }
 0x38f   : > { %v1133_v49 = vmul.f32 %v542_v48, %v1042_v5  ;;  %v1136_v50 = vmul.f32 %v542_v48, %v1044_v6 }
 0x391   : > { %v546_v51 = vadd.f32 %v1136_v50, %v1133_v49 }
 0x393   : > { %547 = vadd.xlane.f32.xlu1 %v546_v51 }
 0x41c   : > { %v548_v52 = vpop.xlane.xlu1 %547 }
 0x41d   : > { %v549_v59 = vmul.f32 0.00390625, %v548_v52 }
 0x41f   : > { %v551_v60 = vmul.f32 %v549_v59, %v1050_v16  ;;  %v550_v61 = vmul.f32 %v549_v59, %v1052_v18  ;;  %v552_v63 = vmul.f32 %v549_v59, %v1055_v20  ;;  %v553_v0 = vmul.f32 %v549_v59, %v1059_v23 }
 0x421   : > { %562 = vperm.xlu1 %915, %v551_v60   ;;  %559 = vperm.xlu0 %916, %v550_v61  }
 0x425   : > { %565 = vperm.xlu0 %916, %v552_v63  }
 0x429   : > { %568 = vperm.xlu0 %916, %v553_v0  }
 0x49c   : > { %v560_v1 = vpop.permute.xlu0 %559  ;;  %v563_v2 = vpop.permute.xlu1 %562 }
 0x49d   : > { %v577_v4 = vrot.slane %v563_v2, %v1072_v40  ;;  %v573_v8 = vrot.slane %v560_v1, %v1072_v40 }
 0x49f   : > { %v586_v18 = vsel %vm348_vm0, %v577_v4, %v573_v8 }
 0x4a0   : > { %v566_v3 = vpop.permute.xlu0 %565 }
 0x4a1   : > { %v581_v10 = vrot.slane %v566_v3, %v1072_v40 }
 0x4a3   : > { %v587_v20 = vsel %vm350_vm1, %v581_v10, %v586_v18 }
 0x4a4   : > { %v569_v16 = vpop.permute.xlu0 %568 }
 0x4a5   : > { %v585_v11 = vrot.slane %v569_v16, %v1072_v40 }
 0x4a7   : > { %v588_v12 = vsel %vm352_vm2, %v585_v11, %v587_v20 }
 0x4a8   : > { %v590_v23 = vsel %vm355_vm3, %v588_v12, 0.0 }
 0x4a9   : > { %591 = vadd.xlane.f32.xlu0 %v590_v23 }
 0x532   : > { %v592_v13 = vpop.xlane.xlu0 %591 }
 0x533   : > { %v593_v14 = vadd.f32 %v592_v13, %v1083_v53 }
 0x535   : > { %v594_v15 = vmax.f32 %v593_v14, 0.0 }
 0x537   : > { %v595_v17 = vmul.f32 %v594_v15, %v1085_v54  ;;  %v596_v19 = vmul.f32 %v594_v15, %v1087_v55  ;;  %v597_v21 = vmul.f32 %v594_v15, %v1089_v56  ;;  %v598_v22 = vmul.f32 %v594_v15, %v1091_v57 }
 0x538   : > { %v599_v24 = vmul.f32 %v594_v15, %v1093_v58  ;;  %v600_v25 = vmul.f32 %v594_v15, %v1096_v62  ;;  %v601_v53 = vmul.f32 %v594_v15, %v1104_v7  ;;  %v602_v54 = vmul.f32 %v594_v15, %v1107_v9 }
 0x539   : > { %612 = vperm.xlu1 %915, %v595_v17  }
 0x53d   : > { %615 = vperm.xlu1 %915, %v596_v19  }
 0x541   : > { %618 = vperm.xlu1 %915, %v597_v21  }
 0x545   : > { %621 = vperm.xlu1 %915, %v598_v22   ;;  %v722_v22 = vstv %s721_s17 }
 0x549   : > { %624 = vperm.xlu1 %915, %v599_v24   ;;  %v726_v24 = vstv %s885_s18 }
 0x54d   : > { %627 = vperm.xlu1 %915, %v600_v25  }
 0x551   : > { %630 = vperm.xlu1 %915, %v601_v53  }
 0x555   : > { %633 = vperm.xlu1 %915, %v602_v54  }
 0x5b4   : > { %v613_v55 = vpop.permute.xlu1 %612 }
 0x5b5   : > { %v638_v30 = vrot.slane %v613_v55, %v1072_v40 }
 0x5b8   : > { %v616_v26 = vpop.permute.xlu1 %615 }
 0x5b9   : > { %v642_v57 = vrot.slane %v616_v26, %v1072_v40 }
 0x5bb   : > { %v667_v9 = vsel %vm348_vm0, %v642_v57, %v638_v30 }
 0x5bc   : > { %v619_v27 = vpop.permute.xlu1 %618 }
 0x5bd   : > { %v646_v58 = vrot.slane %v619_v27, %v1072_v40 }
 0x5bf   : > { %v668_v33 = vsel %vm350_vm1, %v646_v58, %v667_v9 }
 0x5c0   : > { %v622_v56 = vpop.permute.xlu1 %621 }
 0x5c1   : > { %v650_v62 = vrot.slane %v622_v56, %v1072_v40  ;;  %v732_v56 = vstv %s886_s19 }
 0x5c3   : > { %v669_v35 = vsel %vm352_vm2, %v650_v62, %v668_v33 }
 0x5c4   : > { %v625_v28 = vpop.permute.xlu1 %624 }
 0x5c5   : > { %v654_v7 = vrot.slane %v625_v28, %v1072_v40 }
 0x5c7   : > { %v670_v36 = vsel %vm510_vm4, %v654_v7, %v669_v35 }
 0x5c8   : > { %v628_v29 = vpop.permute.xlu1 %627 }
 0x5c9   : > { %v658_v32 = vrot.slane %v628_v29, %v1072_v40 }
 0x5cb   : > { %v671_v38 = vsel %vm512_vm5, %v658_v32, %v670_v36 }
 0x5cc   : > { %v631_v31 = vpop.permute.xlu1 %630 }
 0x5cd   : > { %v662_v34 = vrot.slane %v631_v31, %v1072_v40 }
 0x5cf   : > { %v672_v42 = vsel %vm514_vm6, %v662_v34, %v671_v38 }
 0x5d0   : > { %v634_v37 = vpop.permute.xlu1 %633 }
 0x5d1   : > { %v666_v39 = vrot.slane %v634_v37, %v1072_v40 }
 0x5d3   : > { %v673_v43 = vsel %vm516_vm7, %v666_v39, %v672_v42 }
 0x5d4   : > { %v675_v44 = vsel %vm519_vm8, %v673_v43, 0.0 }
 0x5d5   : > { %676 = vadd.xlane.f32.xlu0 %v675_v44 }
 0x65e   : > { %v677_v45 = vpop.xlane.xlu0 %676 }
 0x65f   : > { %v678_v46 = vadd.f32 %v677_v45, %v1129_v41 }
 0x661   : > { %v884_v47 = vmul.f32 -1.442695, %v678_v46 }
 0x663   : > { %921 = vpow2.f32 %v884_v47 }
 0x670   : > { %v922_v48 = vpop.eup %921 }
 0x671   : > { %v682_v51 = vadd.f32 1.0, %v922_v48 }
 0x673   : > { %923 = vrcp.f32 %v682_v51 }
 0x680   : > { %v924_v52 = vpop.eup %923 }
 0x681   : > { %687 = vperm.xlu1 %915, %v924_v52  }
 0x6fc   : > { %v688_v59 = vpop.permute.xlu1 %687 }
 0x6fd   : > { %v690_v40 = vmul.f32 %v688_v59, %v1133_v49  ;;  %v691_v60 = vmul.f32 %v688_v59, %v1136_v50 }
 0x6ff   : > { %v1181_v61 = vadd.f32 %v690_v40, %v1042_v5  ;;  %v1184_v63 = vadd.f32 %v691_v60, %v1044_v6 }
 0x701   : > { %v694_v41 = vrot.slane %v1181_v61, 4  ;;  %v700_v0 = vrot.slane %v1184_v63, 4 }
 0x703   : > { %v695_v1 = vadd.f32 %v694_v41, %v1181_v61  ;;  %v701_v2 = vadd.f32 %v700_v0, %v1184_v63  ;;  %v710_v3 = vmax.f32 %v1181_v61, %v694_v41  ;;  %v716_v49 = vmax.f32 %v1184_v63, %v700_v0 }
 0x705   : > { %v696_v50 = vrot.slane %v695_v1, 2  ;;  %v702_v4 = vrot.slane %v701_v2, 2  ;;  %v711_v8 = vrot.slane %v710_v3, 2  ;;  %v717_v10 = vrot.slane %v716_v49, 2 }
 0x707   : > { %v697_v16 = vadd.f32 %v696_v50, %v695_v1  ;;  %v703_v18 = vadd.f32 %v702_v4, %v701_v2  ;;  %v712_v11 = vmax.f32 %v710_v3, %v711_v8  ;;  %v718_v20 = vmax.f32 %v716_v49, %v717_v10 }
 0x709   : > { %v698_v12 = vrot.slane %v697_v16, 1  ;;  %v704_v23 = vrot.slane %v703_v18, 1  ;;  %v713_v13 = vrot.slane %v712_v11, 1  ;;  %v719_v14 = vrot.slane %v718_v20, 1 }
 0x70b   : > { %v699_v15 = vadd.f32 %v698_v12, %v697_v16  ;;  %v705_v17 = vadd.f32 %v704_v23, %v703_v18  ;;  %v714_v19 = vmax.f32 %v712_v11, %v713_v13  ;;  %v720_v21 = vmax.f32 %v718_v20, %v719_v14 }
 0x70d   : > { %v707_v25 = vmul.f32 0.125, %v699_v15  ;;  %v708_v53 = vmul.f32 0.125, %v705_v17  ;;  %v727_v26 = vmul.f32 %v726_v24, %v714_v19  ;;  %v728_v27 = vmul.f32 %v726_v24, %v720_v21 }
 0x70f   : > { %v723_v54 = vmul.f32 %v722_v22, %v707_v25  ;;  %v724_v55 = vmul.f32 %v722_v22, %v708_v53 }
 0x711   : > { %v729_v28 = vadd.f32 %v727_v26, %v723_v54  ;;  %v730_v29 = vadd.f32 %v728_v27, %v724_v55 }
 0x713   : > { %v733_v57 = vadd.f32 %v732_v56, %v729_v28  ;;  %v734_v58 = vadd.f32 %v732_v56, %v730_v29 }
 0x715   : > { %v887_v30 = vmul.f32 -1.442695, %v733_v57  ;;  %v888_v62 = vmul.f32 -1.442695, %v734_v58 }
 0x717   : > { %925 = vpow2.f32 %v887_v30 }
 0x718   : > { %927 = vpow2.f32 %v888_v62 }
 0x724   : > { %v926_v7 = vpop.eup %925 }
 0x725   : > { %v928_v31 = vpop.eup %927  ;;  %v741_v9 = vadd.f32 1.0, %v926_v7 }
 0x726   : > { %v742_v32 = vadd.f32 1.0, %v928_v31 }
 0x727   : > { %929 = vrcp.f32 %v741_v9 }
 0x728   : > { %931 = vrcp.f32 %v742_v32 }
 0x734   : > { %v930_v33 = vpop.eup %929 }
 0x735   : > { %v932_v34 = vpop.eup %931  ;;  %v747_v35 = vmul.f32 %v930_v33, %v1181_v61 }
 0x736   : > { %v748_v36 = vmul.f32 %v932_v34, %v1184_v63 }
 0x737   : > { %v749_v37 = vrot.slane %v747_v35, 4 }
 0x738   : > { %v755_v38 = vrot.slane %v748_v36, 4 }
 0x739   : > { %v750_v39 = vadd.f32 %v749_v37, %v747_v35  ;;  %v764_v42 = vmax.f32 %v747_v35, %v749_v37 }
 0x73a   : > { %v756_v43 = vadd.f32 %v755_v38, %v748_v36  ;;  %v770_v44 = vmax.f32 %v748_v36, %v755_v38 }
 0x73b   : > { %v751_v45 = vrot.slane %v750_v39, 2  ;;  %v765_v46 = vrot.slane %v764_v42, 2 }
 0x73c   : > { %v757_v47 = vrot.slane %v756_v43, 2  ;;  %v771_v48 = vrot.slane %v770_v44, 2 }
 0x73d   : > { %v752_v51 = vadd.f32 %v751_v45, %v750_v39  ;;  %v766_v52 = vmax.f32 %v764_v42, %v765_v46 }
 0x73e   : > { %v758_v59 = vadd.f32 %v757_v47, %v756_v43  ;;  %v772_v40 = vmax.f32 %v770_v44, %v771_v48 }
 0x73f   : > { %v753_v60 = vrot.slane %v752_v51, 1  ;;  %v767_v41 = vrot.slane %v766_v52, 1 }
 0x740   : > { %v759_v0 = vrot.slane %v758_v59, 1  ;;  %v773_v1 = vrot.slane %v772_v40, 1 }
 0x741   : > { %v754_v2 = vadd.f32 %v753_v60, %v752_v51  ;;  %v768_v3 = vmax.f32 %v766_v52, %v767_v41 }
 0x742   : > { %v760_v49 = vadd.f32 %v759_v0, %v758_v59  ;;  %v774_v50 = vmax.f32 %v772_v40, %v773_v1 }
 0x743   : > { %v761_v4 = vmul.f32 0.125, %v754_v2  ;;  %v777_v16 = vmul.f32 %v768_v3, %v726_v24 }
 0x744   : > { %v762_v8 = vmul.f32 0.125, %v760_v49  ;;  %v778_v11 = vmul.f32 %v774_v50, %v726_v24 }
 0x745   : > { %v775_v10 = vmul.f32 %v761_v4, %v722_v22 }
 0x746   : > { %v776_v18 = vmul.f32 %v762_v8, %v722_v22 }
 0x747   : > { %v779_v20 = vadd.f32 %v777_v16, %v775_v10 }
 0x748   : > { %v780_v12 = vadd.f32 %v778_v11, %v776_v18 }
 0x749   : > { %v781_v23 = vadd.f32 %v779_v20, %v732_v56 }
 0x74a   : > { %v782_v13 = vadd.f32 %v780_v12, %v732_v56 }
 0x74b   : > { %v889_v14 = vmul.f32 -1.442695, %v781_v23 }
 0x74c   : > { %v890_v15 = vmul.f32 -1.442695, %v782_v13 }
 0x74d   : > { %933 = vpow2.f32 %v889_v14 }
 0x74e   : > { %935 = vpow2.f32 %v890_v15 }
 0x75a   : > { %v934_v17 = vpop.eup %933 }
 0x75b   : > { %v936_v19 = vpop.eup %935  ;;  %v789_v21 = vadd.f32 1.0, %v934_v17 }
 0x75c   : > { %v790_v25 = vadd.f32 1.0, %v936_v19 }
 0x75d   : > { %937 = vrcp.f32 %v789_v21 }
 0x75e   : > { %939 = vrcp.f32 %v790_v25 }
 0x76a   : > { %v938_v53 = vpop.eup %937 }
 0x76b   : > { %v940_v54 = vpop.eup %939  ;;  %v795_v55 = vmul.f32 %v938_v53, %v747_v35 }
 0x76c   : > { %v796_v22 = vmul.f32 %v940_v54, %v748_v36 }
 0x76d   : > { %v797_v24 = vadd.f32 %v795_v55, %v1181_v61 }
 0x76e   : > { %v798_v26 = vadd.f32 %v796_v22, %v1184_v63 }
 0x76f   : > { %v799_v27 = vadd.f32 %v797_v24, %v1042_v5 }
 0x770   : > { %v800_v56 = vadd.f32 %v798_v26, %v1044_v6 }
 0x771   : > { %801 = vst [vmem:[%s265_s24] sm:$0xff] %v799_v27 }
 0x772   : > { %802 = vst [vmem:[%s265_s24 + $0x8] sm:$0xff] %v800_v56 }
 0x773 PF: > { %s17_s21 = sadd.s32 1, %s966_s21  }
 0x774   : > { %p14_p1 = scmp.ge.s32.totalorder %s17_s21, 4  }
 0x776   :  { %16 = sbr.rel (!%p14_p1) target bundleno = 1 (0x1), region = 79 }
 0x77b   :  { %824 = vsyncpa [#allocation3], 1 }
 0x77c   :  { %826 = vsyncpa [#allocation3 + $0x1], 1 }

</bundles_post_ra>
